<compile_context>
chip_gen: v7x
topology: tpu7x:2x2x1
jax: 0.10.0
libtpu: 0.0.40
codegen_flags: <defaults>
</compile_context>

<pallas_src>
import functools

import jax
import jax.numpy as jnp
from jax import lax
from jax.experimental import pallas as pl
from jax.experimental.pallas import tpu as pltpu

HIDDEN = 32                      # fc1/fc2 width from the module definition
TILE_B_MAX = 32768               # batch-lane tile; must be a multiple of 128
VMEM_LIMIT_BYTES = 48 * 1024 * 1024


def _round_up(n, m):
    return ((n + m - 1) // m) * m


def _sigmoid_one_eup(h):
    # sigmoid(h) == 0.5 * (tanh(h/2) + 1): a single EUP transcendental per
    # element; the mul/add go to the VPU (which has slack in this kernel).
    return 0.5 * (jnp.tanh(0.5 * h) + 1.0)


def _feature_encoder_kernel(x_ref, w1_ref, b1_ref, w2_ref, b2_ref,
                            w3_ref, b3_ref, o_ref):
    """One batch tile of the fused 3-layer MLP, feature-major layout.

    x_ref : (obs_dim, TILE_B)    o_ref : (out_dim, TILE_B)
    wN    : (out_feat, in_feat)  bN    : (out_feat, 1)
    """
    # Cast in-kernel so the input is DMA'd at its native dtype (bf16 halves
    # input HBM bytes; f32 is a no-op).
    xT = x_ref[...].astype(jnp.float32)

    dot = functools.partial(jnp.dot, preferred_element_type=jnp.float32,
                            precision=lax.Precision.HIGHEST)

    # fc1 + sigmoid : (32, obs_dim) @ (obs_dim, T) -> (32, T)
    h1 = _sigmoid_one_eup(dot(w1_ref[...], xT) + b1_ref[...])
    # fc2 + sigmoid : (32, 32) @ (32, T) -> (32, T)
    h2 = _sigmoid_one_eup(dot(w2_ref[...], h1) + b2_ref[...])
    # fc3 (no activation) : (out_dim, 32) @ (32, T) -> (out_dim, T)
    o_ref[...] = (dot(w3_ref[...], h2) + b3_ref[...]).astype(o_ref.dtype)


def feature_encoder_fm(xT, params, *, tile_b=None):
    """Fused MLP on feature-major input.

    xT: (obs_dim, B), any float dtype.  Returns (out_dim, B) float32.
    No wrapper-side transposes: produce xT at the producer and consume the
    feature-major output directly for the fastest end-to-end path.
    """
    w1, b1 = params["w1"], params["b1"]
    w2, b2 = params["w2"], params["b2"]
    w3, b3 = params["w3"], params["b3"]

    obs_dim, B = xT.shape
    out_dim = w3.shape[0]

    # Pad the lane (batch) axis only to the next multiple of 128 (<=127 lanes,
    # XLA fuses it with the preceding layout op).  Blocks past this are handled
    # by Pallas' masked ragged-last-block machinery.
    b_lane = _round_up(max(B, 1), 128)
    if tile_b is None:
        tile_b = min(TILE_B_MAX, b_lane)
    tile_b = min(tile_b, b_lane)
    assert tile_b % 128 == 0, "batch tile must be a multiple of 128 lanes"

    if b_lane != B:
        xT = jnp.pad(xT, ((0, 0), (0, b_lane - B)))

    grid = (pl.cdiv(b_lane, tile_b),)

    # Weights/biases: full-array blocks with a constant index_map -> they stay
    # VMEM-resident across all grid iterations (no re-DMA).
    def resident(arr):
        return pl.BlockSpec(arr.shape, lambda i: (0, 0))

    outT = pl.pallas_call(
        _feature_encoder_kernel,
        out_shape=jax.ShapeDtypeStruct((out_dim, b_lane), jnp.float32),
        grid=grid,
        in_specs=[
            pl.BlockSpec((obs_dim, tile_b), lambda i: (0, i)),   # x tile
            resident(w1), resident(b1),
            resident(w2), resident(b2),
            resident(w3), resident(b3),
        ],
        out_specs=pl.BlockSpec((out_dim, tile_b), lambda i: (0, i)),
        compiler_params=pltpu.CompilerParams(
            # On v7x, switch to pltpu.CORE_PARALLEL if a profile shows one
            # TensorCore idle on the batch axis.
            dimension_semantics=("parallel",),
            vmem_limit_bytes=VMEM_LIMIT_BYTES,
        ),
    )(xT, w1, b1, w2, b2, w3, b3)

    if b_lane != B:
        outT = outT[:, :B]
    return outT


def feature_encoder(x, params, *, tile_b=None):
    """Drop-in FeatureEncoder.forward: x (B, obs_dim) -> (B, out_dim) float32.

    The two transposes below are layout plumbing for exact nn.Module parity;
    performance-critical callers should use feature_encoder_fm directly
    (feature-major in/out) so no extra HBM passes remain.
    """
    outT = feature_encoder_fm(jnp.transpose(x), params, tile_b=tile_b)
    return jnp.transpose(outT)


def init_params(key, obs_dim, output_dim):
    """nn.Linear init: U(-1/sqrt(fan_in), 1/sqrt(fan_in)); w (out,in), b (out,1)."""
    ks = jax.random.split(key, 6)

    def linear(kw, kb, fan_in, fan_out):
        bound = 1.0 / jnp.sqrt(jnp.float32(fan_in))
        w = jax.random.uniform(kw, (fan_out, fan_in), jnp.float32, -bound, bound)
        b = jax.random.uniform(kb, (fan_out, 1), jnp.float32, -bound, bound)
        return w, b

    w1, b1 = linear(ks[0], ks[1], obs_dim, HIDDEN)
    w2, b2 = linear(ks[2], ks[3], HIDDEN, HIDDEN)
    w3, b3 = linear(ks[4], ks[5], HIDDEN, output_dim)
    return {"w1": w1, "b1": b1, "w2": w2, "b2": b2, "w3": w3, "b3": b3}


def feature_encoder_ref(x, p):
    x = x.astype(jnp.float32)
    h1 = jax.nn.sigmoid(x @ p["w1"].T + p["b1"].T)
    h2 = jax.nn.sigmoid(h1 @ p["w2"].T + p["b2"].T)
    return h2 @ p["w3"].T + p["b3"].T


if __name__ == "__main__":
    obs_dim = 4
    output_dim = 8
    batch = 2

    key = jax.random.PRNGKey(0)
    k_params, k_x = jax.random.split(key)
    params = init_params(k_params, obs_dim, output_dim)
    x = jax.random.normal(k_x, (batch, obs_dim), jnp.float32)

    out = jax.block_until_ready(feature_encoder(x, params))
    ref = feature_encoder_ref(x, params)
    assert out.shape == (batch, output_dim)
    assert jnp.allclose(out, ref, atol=1e-5, rtol=1e-5)

    # Non-128-aligned batch with a small explicit tile: exercises the
    # multi-block grid and the ragged, masked last block.
    x_big = jax.random.normal(jax.random.PRNGKey(1), (1000, obs_dim), jnp.float32)
    out_big = jax.block_until_ready(feature_encoder(x_big, params, tile_b=384))
    ref_big = feature_encoder_ref(x_big, params)
    assert out_big.shape == (1000, output_dim)
    assert jnp.allclose(out_big, ref_big, atol=1e-5, rtol=1e-5)

    # Feature-major fast path (no wrapper transposes at all).
    out_fm = jax.block_until_ready(
        feature_encoder_fm(jnp.transpose(x_big), params))
    assert out_fm.shape == (output_dim, 1000)
    assert jnp.allclose(out_fm, ref_big.T, atol=1e-5, rtol=1e-5)

    print("KERNEL_OK")
</pallas_src>

<mosaic_0001>
module attributes {stable_mosaic.version = 11 : i64} {
  func.func @_feature_encoder_kernel(%arg0: i32, %arg1: memref<4x128xf32, #tpu.memory_space<vmem>>, %arg2: memref<32x4xf32, #tpu.memory_space<vmem>>, %arg3: memref<32x1xf32, #tpu.memory_space<vmem>>, %arg4: memref<32x32xf32, #tpu.memory_space<vmem>>, %arg5: memref<32x1xf32, #tpu.memory_space<vmem>>, %arg6: memref<8x32xf32, #tpu.memory_space<vmem>>, %arg7: memref<8x1xf32, #tpu.memory_space<vmem>>, %arg8: memref<8x128xf32, #tpu.memory_space<vmem>>) attributes {dimension_semantics = [#tpu.dimension_semantics<parallel>], iteration_bounds = array<i64: 1>, scalar_prefetch = 0 : i64, scratch_operands = 0 : i64, tpu.core_type = #tpu.core_type<tc>, window_params = [{transform_indices = @transform_0, window_bounds = array<i64: 4, 128>}, {pipeline_mode = #tpu.pipeline_mode<synchronous>, transform_indices = @transform_1, window_bounds = array<i64: 32, 4>}, {pipeline_mode = #tpu.pipeline_mode<synchronous>, transform_indices = @transform_2, window_bounds = array<i64: 32, 1>}, {pipeline_mode = #tpu.pipeline_mode<synchronous>, transform_indices = @transform_3, window_bounds = array<i64: 32, 32>}, {pipeline_mode = #tpu.pipeline_mode<synchronous>, transform_indices = @transform_4, window_bounds = array<i64: 32, 1>}, {pipeline_mode = #tpu.pipeline_mode<synchronous>, transform_indices = @transform_5, window_bounds = array<i64: 8, 32>}, {pipeline_mode = #tpu.pipeline_mode<synchronous>, transform_indices = @transform_6, window_bounds = array<i64: 8, 1>}, {transform_indices = @transform_7, window_bounds = array<i64: 8, 128>}]} {
    %c0 = arith.constant 0 : index
    %c0_0 = arith.constant 0 : index
    %0 = vector.load %arg1[%c0, %c0_0] : memref<4x128xf32, #tpu.memory_space<vmem>>, vector<4x128xf32>
    %c0_1 = arith.constant 0 : index
    %c0_2 = arith.constant 0 : index
    %1 = vector.load %arg2[%c0_1, %c0_2] : memref<32x4xf32, #tpu.memory_space<vmem>>, vector<32x4xf32>
    %cst = arith.constant dense<0.000000e+00> : vector<32x128xf32>
    %2 = tpu.matmul %1, %0, %cst {dimension_numbers = #tpu.dot_dimension_numbers<[1], [0], [0], [1], [0, 0, 1, 1], [], []>, precision = #tpu.contract_precision<fp32>} : vector<32x4xf32>, vector<4x128xf32>, vector<32x128xf32> -> vector<32x128xf32>
    %c0_3 = arith.constant 0 : index
    %c0_4 = arith.constant 0 : index
    %3 = vector.load %arg3[%c0_3, %c0_4] : memref<32x1xf32, #tpu.memory_space<vmem>>, vector<32x1xf32>
    %4 = vector.broadcast %3 : vector<32x1xf32> to vector<32x128xf32>
    %5 = arith.addf %2, %4 : vector<32x128xf32>
    %cst_5 = arith.constant 5.000000e-01 : f32
    %6 = vector.broadcast %cst_5 : f32 to vector<32x128xf32>
    %7 = arith.mulf %6, %5 : vector<32x128xf32>
    %8 = math.tanh %7 : vector<32x128xf32>
    %cst_6 = arith.constant 1.000000e+00 : f32
    %9 = vector.broadcast %cst_6 : f32 to vector<32x128xf32>
    %10 = arith.addf %8, %9 : vector<32x128xf32>
    %cst_7 = arith.constant 5.000000e-01 : f32
    %11 = vector.broadcast %cst_7 : f32 to vector<32x128xf32>
    %12 = arith.mulf %11, %10 : vector<32x128xf32>
    %c0_8 = arith.constant 0 : index
    %c0_9 = arith.constant 0 : index
    %13 = vector.load %arg4[%c0_8, %c0_9] : memref<32x32xf32, #tpu.memory_space<vmem>>, vector<32x32xf32>
    %cst_10 = arith.constant dense<0.000000e+00> : vector<32x128xf32>
    %14 = tpu.matmul %13, %12, %cst_10 {dimension_numbers = #tpu.dot_dimension_numbers<[1], [0], [0], [1], [0, 0, 1, 1], [], []>, precision = #tpu.contract_precision<fp32>} : vector<32x32xf32>, vector<32x128xf32>, vector<32x128xf32> -> vector<32x128xf32>
    %c0_11 = arith.constant 0 : index
    %c0_12 = arith.constant 0 : index
    %15 = vector.load %arg5[%c0_11, %c0_12] : memref<32x1xf32, #tpu.memory_space<vmem>>, vector<32x1xf32>
    %16 = vector.broadcast %15 : vector<32x1xf32> to vector<32x128xf32>
    %17 = arith.addf %14, %16 : vector<32x128xf32>
    %cst_13 = arith.constant 5.000000e-01 : f32
    %18 = vector.broadcast %cst_13 : f32 to vector<32x128xf32>
    %19 = arith.mulf %18, %17 : vector<32x128xf32>
    %20 = math.tanh %19 : vector<32x128xf32>
    %cst_14 = arith.constant 1.000000e+00 : f32
    %21 = vector.broadcast %cst_14 : f32 to vector<32x128xf32>
    %22 = arith.addf %20, %21 : vector<32x128xf32>
    %cst_15 = arith.constant 5.000000e-01 : f32
    %23 = vector.broadcast %cst_15 : f32 to vector<32x128xf32>
    %24 = arith.mulf %23, %22 : vector<32x128xf32>
    %c0_16 = arith.constant 0 : index
    %c0_17 = arith.constant 0 : index
    %25 = vector.load %arg6[%c0_16, %c0_17] : memref<8x32xf32, #tpu.memory_space<vmem>>, vector<8x32xf32>
    %cst_18 = arith.constant dense<0.000000e+00> : vector<8x128xf32>
    %26 = tpu.matmul %25, %24, %cst_18 {dimension_numbers = #tpu.dot_dimension_numbers<[1], [0], [0], [1], [0, 0, 1, 1], [], []>, precision = #tpu.contract_precision<fp32>} : vector<8x32xf32>, vector<32x128xf32>, vector<8x128xf32> -> vector<8x128xf32>
    %c0_19 = arith.constant 0 : index
    %c0_20 = arith.constant 0 : index
    %27 = vector.load %arg7[%c0_19, %c0_20] : memref<8x1xf32, #tpu.memory_space<vmem>>, vector<8x1xf32>
    %28 = vector.broadcast %27 : vector<8x1xf32> to vector<8x128xf32>
    %29 = arith.addf %26, %28 : vector<8x128xf32>
    %c0_21 = arith.constant 0 : index
    %c0_22 = arith.constant 0 : index
    %30 = vector.load %arg8[%c0_21, %c0_22] : memref<8x128xf32, #tpu.memory_space<vmem>>, vector<8x128xf32>
    tpu.vector_store %arg8[%c0_21, %c0_22], %29 {strides = array<i32>} : memref<8x128xf32, #tpu.memory_space<vmem>>, vector<8x128xf32>,
    return
  }
  func.func @transform_0(%arg0: i32) -> (i32, i32) {
    %c0_i32 = arith.constant 0 : i32
    %c0_i32_0 = arith.constant 0 : i32
    return %c0_i32, %arg0 : i32, i32
  }
  func.func @transform_1(%arg0: i32) -> (i32, i32) {
    %c0_i32 = arith.constant 0 : i32
    %c0_i32_0 = arith.constant 0 : i32
    %c0_i32_1 = arith.constant 0 : i32
    return %c0_i32, %c0_i32_0 : i32, i32
  }
  func.func @transform_2(%arg0: i32) -> (i32, i32) {
    %c0_i32 = arith.constant 0 : i32
    %c0_i32_0 = arith.constant 0 : i32
    %c0_i32_1 = arith.constant 0 : i32
    return %c0_i32, %c0_i32_0 : i32, i32
  }
  func.func @transform_3(%arg0: i32) -> (i32, i32) {
    %c0_i32 = arith.constant 0 : i32
    %c0_i32_0 = arith.constant 0 : i32
    %c0_i32_1 = arith.constant 0 : i32
    return %c0_i32, %c0_i32_0 : i32, i32
  }
  func.func @transform_4(%arg0: i32) -> (i32, i32) {
    %c0_i32 = arith.constant 0 : i32
    %c0_i32_0 = arith.constant 0 : i32
    %c0_i32_1 = arith.constant 0 : i32
    return %c0_i32, %c0_i32_0 : i32, i32
  }
  func.func @transform_5(%arg0: i32) -> (i32, i32) {
    %c0_i32 = arith.constant 0 : i32
    %c0_i32_0 = arith.constant 0 : i32
    %c0_i32_1 = arith.constant 0 : i32
    return %c0_i32, %c0_i32_0 : i32, i32
  }
  func.func @transform_6(%arg0: i32) -> (i32, i32) {
    %c0_i32 = arith.constant 0 : i32
    %c0_i32_0 = arith.constant 0 : i32
    %c0_i32_1 = arith.constant 0 : i32
    return %c0_i32, %c0_i32_0 : i32, i32
  }
  func.func @transform_7(%arg0: i32) -> (i32, i32) {
    %c0_i32 = arith.constant 0 : i32
    %c0_i32_0 = arith.constant 0 : i32
    return %c0_i32, %arg0 : i32, i32
  }
}

</mosaic_0001>

<bundles_post_ra>
// kernel: tpu_custom_call.1
= control target key start
LH: loop header
LB: loop body
LE: loop exit
PB: predicated region body
PF: predicated region fallthrough
CT: control target
= control target key end

     0   :  { %vm69_vm0 = vcmask 1043456   ;;  %vm56_vm1 = vcmask 31744   ;;  %v2340_v12 = vmov 0   ;;  %s2590_s0 = inlined_call_operand.vmem [shape: f32[4,128], index: 0, kind: input, shape index: {}]   ;;  %s2591_s1 = inlined_call_operand.vmem [shape: f32[32,4], index: 1, kind: input, shape index: {}]   ;;  %s2592_s2 = inlined_call_operand.vmem [shape: f32[32,1], index: 2, kind: input, shape index: {}]   ;;  %s2593_s3 = inlined_call_operand.vmem [shape: f32[32,32], index: 3, kind: input, shape index: {}]   ;;  %s2594_s4 = inlined_call_operand.vmem [shape: f32[32,1], index: 4, kind: input, shape index: {}]   ;;  %s2595_s5 = inlined_call_operand.vmem [shape: f32[8,32], index: 5, kind: input, shape index: {}]   ;;  %s2596_s6 = inlined_call_operand.vmem [shape: f32[8,1], index: 6, kind: input, shape index: {}]   ;;  %s2597_s7 = inlined_call_operand.hbm [shape: f32[8,128], index: 7, kind: output, shape index: {}]  }
   0x1   :  { %v27_v0 = vld [vmem:[%s2590_s0] sm:$0xf]  ;;  %v29_v2 = vld [vmem:[%s2591_s1 + $0x8] sm:$0xff]  ;;  %v30_v6 = vld [vmem:[%s2591_s1 + $0x10] sm:$0xff]  ;;  %2298 = vset.pattern.permute.xlu0 %v2340_v12  ;;  %2299 = vset.pattern.permute.xlu1 %v2340_v12 }
   0x2   :  { %v28_v1 = vld [vmem:[%s2591_s1] sm:$0xff]  ;;  %v71_v3 = vsel %vm69_vm0, %v27_v0, 0  ;;  %v61_v5 = vsel %vm56_vm1, %v29_v2, 0  ;;  %v31_v7 = vld [vmem:[%s2591_s1 + $0x18] sm:$0xff]  ;;  %v64_v11 = vsel %vm56_vm1, %v30_v6, 0  ;;  %v34_v16 = vld [vmem:[%s2592_s2 + $0x10] sm:$0xff] }
   0x3   :  { %v58_v4 = vsel %vm56_vm1, %v28_v1, 0  ;;  %v2402_v8 = vand.u32 4294901760, %v71_v3  ;;  %v2406_v10 = vand.u32 4294901760, %v61_v5  ;;  %v32_v13 = vld [vmem:[%s2592_s2] sm:$0xff]  ;;  %v2412_v14 = vand.u32 4294901760, %v64_v11  ;;  %v33_v21 = vld [vmem:[%s2592_s2 + $0x8] sm:$0xff]  ;;  %48 = vperm.xlu1 %2299, %v34_v16  }
   0x4   :  { %v2404_v9 = vand.u32 4294901760, %v58_v4  ;;  %v67_v15 = vsel %vm56_vm1, %v31_v7, 0  ;;  %38 = vperm.xlu0 %2298, %v32_v13  }
   0x5   :  { %v181_v17 = vsub.f32 %v71_v3, %v2402_v8  ;;  %v150_v19 = vsub.f32 %v61_v5, %v2406_v10  ;;  %1953 = vmatprep.subr.mxu1 %v2402_v8  ;;  %v2422_v20 = vand.u32 4294901760, %v67_v15  ;;  %v160_v22 = vsub.f32 %v64_v11, %v2412_v14 }
   0x6   :  { %v140_v18 = vsub.f32 %v58_v4, %v2404_v9  ;;  %1954 = vmatpush3.msra.mxu1 %v2402_v8 }
   0x7   :  { %12 = vsyncpa [#allocation3], 0  ;;  %1969 = vmatprep.subr.mxu0 %v181_v17  ;;  %v170_v24 = vsub.f32 %v67_v15, %v2422_v20  ;;  %v151_v25 = vand.u32 4294901760, %v150_v19  ;;  %v182_v26 = vand.u32 4294901760, %v181_v17  ;;  %v161_v27 = vand.u32 4294901760, %v160_v22  ;;  %v35_v28 = vld [vmem:[%s2592_s2 + $0x18] sm:$0xff] }
   0x8   :  { %1971 = vmatprep.mubr.f32.mxu0 %v140_v18  ;;  %v141_v23 = vand.u32 4294901760, %v140_v18  ;;  %1970 = vmatpush3.msra.mxu0 %v181_v17  ;;  %v668_v33 = vld [vmem:[%s2594_s4] sm:$0xff]  ;;  %v670_v40 = vld [vmem:[%s2594_s4 + $0x10] sm:$0xff]  ;;  %v669_v42 = vld [vmem:[%s2594_s4 + $0x8] sm:$0xff]  ;;  %vm692_vm2 = vcmask 261120   ;;  %vm2342_vm3 = vmmov 0  }
   0x9   :  { %43 = vperm.xlu0 %2298, %v33_v21   ;;  %1972 = vmatmul.mubr.f32.vlgmr.msra.gmra.mrb[0].mxu0 %v150_v19  ;;  %v152_v30 = vsub.f32 %v150_v19, %v151_v25  ;;  %v171_v31 = vand.u32 4294901760, %v170_v24  ;;  %v183_v32 = vsub.f32 %v181_v17, %v182_v26  ;;  %v162_v34 = vsub.f32 %v160_v22, %v161_v27  ;;  %v1336_v43 = vld [vmem:[%s2596_s6] sm:$0xff]  ;;  %v671_v44 = vld [vmem:[%s2594_s4 + $0x18] sm:$0xff]  ;;  %v666_v13 = vld [vmem:[%s2593_s3 + $0x10] sm:$0xff] }
   0xa   :  { %1977 = vmatprep.subr.mxu0 %v2402_v8  ;;  %v142_v29 = vsub.f32 %v140_v18, %v141_v23  ;;  %1974 = vmatprep.mubr.f32.mxu0 %v160_v22  ;;  %v664_v45 = vld [vmem:[%s2593_s3] sm:$0xff]  ;;  %v700_v15 = vsel %vm692_vm2, %v666_v13, 0  ;;  %v667_v16 = vld [vmem:[%s2593_s3 + $0x18] sm:$0xff] }
   0xb   :  { %1978 = vmatpush3.msra.mxu0 %v2402_v8  ;;  %v153_v36 = vand.u32 4294901760, %v152_v30  ;;  %v172_v37 = vsub.f32 %v170_v24, %v171_v31  ;;  %v184_v38 = vand.u32 4294901760, %v183_v32  ;;  %53 = vperm.xlu1 %2299, %v35_v28   ;;  %v163_v39 = vand.u32 4294901760, %v162_v34 }
   0xc   :  { %v143_v35 = vand.u32 4294901760, %v142_v29  ;;  %1985 = vmatprep.subr.mxu0 %v182_v26  ;;  %v694_v46 = vsel %vm692_vm2, %v664_v45, 0  ;;  %v2490_v18 = vand.u32 4294901760, %v700_v15  ;;  %v703_v19 = vsel %vm692_vm2, %v667_v16, 0 }
   0xd   :  { %674 = vperm.xlu0 %2298, %v668_v33   ;;  %1975 = vmatmul.mubr.f32.gmra.mrb[2].mxu0 %v170_v24  ;;  %v173_v41 = vand.u32 4294901760, %v172_v37  ;;  %v2468_v47 = vand.u32 4294901760, %v694_v46 }
   0xe   :  { %1955 = vmatprep.mubr.f32.mxu1 %v143_v35  ;;  %1979 = vmatprep.mubr.f32.mxu0 %v141_v23 }
   0xf   :  { %1956 = vmatmul.mubr.f32.vlgmr.msra.gmra.mrb[0].mxu1 %v153_v36  ;;  %1961 = vmatprep.subr.mxu1 %v184_v38  ;;  %v2471_v48 = vsub.f32 %v694_v46, %v2468_v47 }
  0x10   :  { %1958 = vmatprep.mubr.f32.mxu1 %v163_v39  ;;  %1962 = vmatpush3.msra.mxu1 %v184_v38 }
  0x11   :  { %684 = vperm.xlu0 %2298, %v670_v40   ;;  %1980 = vmatmul.mubr.f32.vlgmr.msra.gmra.mrb[0].mxu0 %v151_v25  ;;  %v776_v49 = vand.u32 4294901760, %v2471_v48  ;;  %v2496_v25 = vand.u32 4294901760, %v703_v19 }
  0x12   :  { %679 = vperm.xlu1 %2299, %v669_v42   ;;  %1986 = vmatpush3.msra.mxu0 %v182_v26 }
  0x13   :  { %1959 = vmatmul.mubr.f32.gmra.mrb[2].mxu1 %v173_v41  ;;  %1982 = vmatprep.mubr.f32.mxu0 %v161_v27  ;;  %v777_v50 = vsub.f32 %v2471_v48, %v776_v49  ;;  %v2499_v27 = vsub.f32 %v700_v15, %v2490_v18  ;;  %v2503_v36 = vsub.f32 %v703_v19, %v2496_v25 }
  0x14   :  { %1963 = vmatprep.mubr.f32.mxu1 %v2404_v9  ;;  %1993 = vmatprep.subr.mxu0 %v2402_v8 }
  0x15   :  { %1339 = vperm.xlu0 %2298, %v1336_v43   ;;  %1983 = vmatmul.mubr.f32.gmra.mrb[2].mxu0 %v171_v31  ;;  %v778_v51 = vand.u32 4294901760, %v777_v50  ;;  %v796_v39 = vand.u32 4294901760, %v2499_v27 }
  0x16   :  { %689 = vperm.xlu1 %2299, %v671_v44   ;;  %1987 = vmatprep.mubr.f32.mxu0 %v2404_v9 }
  0x17   :  { %1964 = vmatmul.mubr.f32.vlgmr.msra.gmra.mrb[0].mxu1 %v2406_v10 }
  0x18   :  { %1966 = vmatprep.mubr.f32.mxu1 %v2412_v14 }
  0x19   :  { %1988 = vmatmul.mubr.f32.vlgmr.msra.gmra.mrb[0].mxu0 %v2406_v10 }
  0x1a   :  { %1994 = vmatpush3.msra.mxu0 %v2402_v8  ;;  %1990 = vmatprep.mubr.f32.mxu0 %v2412_v14 }
  0x1b   :  { %1967 = vmatmul.mubr.f32.gmra.mrb[2].mxu1 %v2422_v20 }
  0x1c   :  { %2009 = vmatprep.mubr.f32.mxu1 %v778_v51  ;;  %v806_v51 = vand.u32 4294901760, %v2503_v36 }
  0x1d   :  { %1991 = vmatmul.mubr.f32.gmra.mrb[2].mxu0 %v2422_v20 }
  0x1e   :  { %1995 = vmatprep.mubr.f32.mxu0 %v2404_v9 }
  0x21   :  { %1996 = vmatmul.mubr.f32.vlgmr.msra.gmra.mrb[0].mxu0 %v2406_v10  ;;  %v665_v10 = vld [vmem:[%s2593_s3 + $0x8] sm:$0xff] }
  0x22   :  { %1998 = vmatprep.mubr.f32.mxu0 %v2412_v14  ;;  %v697_v14 = vsel %vm692_vm2, %v665_v10, 0 }
  0x23   :  { %v2488_v17 = vand.u32 4294901760, %v697_v14 }
  0x25   :  { %1999 = vmatmul.mubr.f32.gmra.mrb[2].mxu0 %v2422_v20  ;;  %v2494_v23 = vsub.f32 %v697_v14, %v2488_v17 }
  0x27   :  { %v786_v33 = vand.u32 4294901760, %v2494_v23 }
  0x29   :  { %v787_v44 = vsub.f32 %v2494_v23, %v786_v33 }
  0x82   :  { %v49_v57 = vpop.permute.xlu1 %48 }
  0x83   :  { %v39_v54 = vpop.permute.xlu0 %38 }
  0x88   :  { %v44_v58 = vpop.permute.xlu0 %43 }
  0x8a   :  { %v54_v0 = vpop.permute.xlu1 %53 }
  0xea   :  { %v1965_v52 = vpop.f32.mrb[0].mxu1 }
  0xeb   :  { %v251_v53 = vpop.f32.mrb[1].mxu1  ;;  %v2235_v59 = vadd.f32 %v1965_v52, %v44_v58 }
  0xec   :  { %v2237_v60 = vadd.f32 %v251_v53, %v39_v54 }
  0xee   :  { %v1968_v55 = vpop.f32.mrb[2].mxu1 }
  0xef   :  { %v263_v56 = vpop.f32.mrb[3].mxu1  ;;  %v2239_v2 = vadd.f32 %v1968_v55, %v54_v0  ;;  %v797_v55 = vsub.f32 %v2499_v27, %v796_v39  ;;  %v807_v0 = vsub.f32 %v2503_v36, %v806_v51 }
  0xf0   :  { %v2241_v4 = vadd.f32 %v263_v56, %v49_v57 }
  0xf4   :  { %v1997_v61 = vpop.f32.mrb[0].mxu0 }
  0xf5   :  { %v2236_v62 = vadd.f32 %v2235_v59, %v1997_v61  ;;  %v626_v63 = vpop.f32.mrb[1].mxu0 }
  0xf6   :  { %v2238_v1 = vadd.f32 %v2237_v60, %v626_v63  ;;  %v788_v60 = vand.u32 4294901760, %v787_v44 }
  0xf7   :  { %v649_v3 = vmul.f32 0.5, %v2236_v62 }
  0xf8   :  { %v648_v5 = vmul.f32 0.5, %v2238_v1  ;;  %v2000_v6 = vpop.f32.mrb[2].mxu0 }
  0xf9   :  { %2300 = vtanh.f32 %v649_v3  ;;  %v2240_v7 = vadd.f32 %v2239_v2, %v2000_v6  ;;  %v638_v8 = vpop.f32.mrb[3].mxu0  ;;  %v798_v3 = vand.u32 4294901760, %v797_v55 }
  0xfa   :  { %2302 = vtanh.f32 %v648_v5  ;;  %v2242_v9 = vadd.f32 %v2241_v4, %v638_v8 }
  0xfb   :  { %v651_v11 = vmul.f32 0.5, %v2240_v7 }
  0xfc   :  { %v650_v12 = vmul.f32 0.5, %v2242_v9  ;;  %v808_v9 = vand.u32 4294901760, %v807_v0 }
  0xfd   :  { %2304 = vtanh.f32 %v651_v11 }
  0xfe   :  { %2306 = vtanh.f32 %v650_v12  ;;  %v675_v12 = vpop.permute.xlu0 %674 }
 0x103   :  { %v2301_v20 = vpop.eup %2300 }
 0x104   :  { %v2303_v21 = vpop.eup %2302  ;;  %v657_v22 = vadd.f32 1.0, %v2301_v20 }
 0x105   :  { %v656_v24 = vadd.f32 1.0, %v2303_v21  ;;  %v685_v21 = vpop.permute.xlu0 %684 }
 0x106   :  { %v661_v26 = vmul.f32 0.5, %v657_v22 }
 0x107   :  { %v2305_v28 = vpop.eup %2304  ;;  %v660_v29 = vmul.f32 0.5, %v656_v24 }
 0x108   :  { %v2307_v30 = vpop.eup %2306  ;;  %v709_v31 = vand.u32 4294901760, %v661_v26  ;;  %v659_v32 = vadd.f32 1.0, %v2305_v28 }
 0x109   :  { %v706_v34 = vand.u32 4294901760, %v660_v29  ;;  %v658_v35 = vadd.f32 1.0, %v2307_v30 }
 0x10a   :  { %v823_v37 = vsub.f32 %v661_v26, %v709_v31  ;;  %v663_v38 = vmul.f32 0.5, %v659_v32 }
 0x10b   :  { %v2506_v40 = vpack.c.bf16 %v709_v31, %v706_v34  ;;  %v816_v41 = vsub.f32 %v660_v29, %v706_v34  ;;  %v662_v42 = vmul.f32 0.5, %v658_v35 }
 0x10c   :  { %v715_v43 = vand.u32 4294901760, %v663_v38  ;;  %v824_v45 = vand.u32 4294901760, %v823_v37 }
 0x10d   :  { %v712_v46 = vand.u32 4294901760, %v662_v42  ;;  %2152 = vmatprep.subr.bf16.mxu1 %v2506_v40  ;;  %v817_v50 = vand.u32 4294901760, %v816_v41  ;;  %v2167_v52 = vpack.c.bf16 %v823_v37, %v816_v41 }
 0x10e   :  { %v837_v53 = vsub.f32 %v663_v38, %v715_v43  ;;  %2154 = vmatpush3.bf16.msra.mxu1 %v2506_v40  ;;  %v825_v54 = vsub.f32 %v823_v37, %v824_v45 }
 0x10f   :  { %v2155_v56 = vpack.c.bf16 %v715_v43, %v712_v46  ;;  %v830_v57 = vsub.f32 %v662_v42, %v712_v46  ;;  %v818_v58 = vsub.f32 %v816_v41, %v817_v50  ;;  %v2183_v59 = vpack.c.bf16 %v824_v45, %v817_v50 }
 0x110   :  { %v826_v61 = vand.u32 4294901760, %v825_v54  ;;  %v838_v62 = vand.u32 4294901760, %v837_v53 }
 0x111   :  { %2156 = vmatprep.subr.bf16.mxu1 %v2155_v56  ;;  %v819_v63 = vand.u32 4294901760, %v818_v58  ;;  %v831_v1 = vand.u32 4294901760, %v830_v57  ;;  %v2171_v2 = vpack.c.bf16 %v837_v53, %v830_v57 }
 0x112   :  { %2158 = vmatpush3.bf16.msra.mxu1 %v2155_v56  ;;  %v839_v4 = vsub.f32 %v837_v53, %v838_v62 }
 0x113   :  { %v2159_v5 = vpack.c.bf16 %v826_v61, %v819_v63  ;;  %v832_v6 = vsub.f32 %v830_v57, %v831_v1  ;;  %v2187_v7 = vpack.c.bf16 %v838_v62, %v831_v1 }
 0x114   :  { %v840_v8 = vand.u32 4294901760, %v839_v4 }
 0x115   :  { %2010 = vmatmul.mubr.f32.vlgmr.msra.gmra.mrb[4].mxu1 %v788_v60  ;;  %2160 = vmatprep.subr.bf16.mxu1 %v2159_v5  ;;  %v833_v10 = vand.u32 4294901760, %v832_v6 }
 0x116   :  { %2162 = vmatpush3.bf16.msra.mxu1 %v2159_v5  ;;  %2012 = vmatprep.mubr.f32.mxu1 %v798_v3 }
 0x117   :  { %v2163_v11 = vpack.c.bf16 %v840_v8, %v833_v10 }
 0x119   :  { %2013 = vmatmul.mubr.f32.gmra.mrb[6].mxu1 %v808_v9  ;;  %2164 = vmatprep.subr.bf16.mxu1 %v2163_v11 }
 0x11a   :  { %2166 = vmatpush3.bf16.msra.mxu1 %v2163_v11  ;;  %2023 = vmatprep.mubr.f32.mxu1 %v2468_v47 }
 0x11b   :  { %2168 = vmatprep.subr.bf16.mxu1 %v2167_v52 }
 0x11d   :  { %2024 = vmatmul.mubr.f32.vlgmr.msra.gmra.mrb[4].mxu1 %v2488_v17 }
 0x11e   :  { %2170 = vmatpush3.bf16.msra.mxu1 %v2167_v52  ;;  %2026 = vmatprep.mubr.f32.mxu1 %v2490_v18 }
 0x11f   :  { %2172 = vmatprep.subr.bf16.mxu1 %v2171_v2 }
 0x121   :  { %2027 = vmatmul.mubr.f32.gmra.mrb[6].mxu1 %v2496_v25 }
 0x122   :  { %2174 = vmatpush3.bf16.msra.mxu1 %v2171_v2  ;;  %2037 = vmatprep.mubr.f32.mxu1 %v2471_v48  ;;  %v2341_v48 = vmov 0.0|0.0  }
 0x123   :  { %2176 = vmatprep.subr.bf16.mxu1 %v2506_v40  ;;  %2205 = vmatprep.subr.bf16.mxu0 %v2341_v48 }
 0x125   :  { %2038 = vmatmul.mubr.f32.vlgmr.msra.gmra.mrb[4].mxu1 %v2494_v23 }
 0x126   :  { %2178 = vmatpush3.bf16.msra.mxu1 %v2506_v40  ;;  %2040 = vmatprep.mubr.f32.mxu1 %v2499_v27 }
 0x127   :  { %2180 = vmatprep.subr.bf16.mxu1 %v2155_v56 }
 0x129   :  { %2041 = vmatmul.mubr.f32.gmra.mrb[6].mxu1 %v2503_v36 }
 0x12a   :  { %2182 = vmatpush3.bf16.msra.mxu1 %v2155_v56  ;;  %2051 = vmatprep.mubr.f32.mxu1 %v776_v49  ;;  %v2343_v49 = vmov 0.0  }
 0x12b   :  { %2184 = vmatprep.subr.bf16.mxu1 %v2183_v59  ;;  %2104 = vmatprep.mubr.msk.f32.mxu0 %vm2342_vm3, %v2343_v49 }
 0x12d   :  { %2052 = vmatmul.mubr.f32.vlgmr.msra.gmra.mrb[4].mxu1 %v786_v33 }
 0x12e   :  { %2186 = vmatpush3.bf16.msra.mxu1 %v2183_v59  ;;  %2054 = vmatprep.mubr.f32.mxu1 %v796_v39 }
 0x12f   :  { %2188 = vmatprep.subr.bf16.mxu1 %v2187_v7 }
 0x131   :  { %2055 = vmatmul.mubr.f32.gmra.mrb[6].mxu1 %v806_v51 }
 0x132   :  { %2190 = vmatpush3.bf16.msra.mxu1 %v2187_v7  ;;  %2065 = vmatprep.mubr.f32.mxu1 %v2468_v47 }
 0x133   :  { %2192 = vmatprep.subr.bf16.mxu1 %v2506_v40 }
 0x135   :  { %2066 = vmatmul.mubr.f32.vlgmr.msra.gmra.mrb[4].mxu1 %v2488_v17 }
 0x136   :  { %2194 = vmatpush3.bf16.msra.mxu1 %v2506_v40  ;;  %2068 = vmatprep.mubr.f32.mxu1 %v2490_v18 }
 0x137   :  { %2196 = vmatprep.subr.bf16.mxu1 %v2155_v56 }
 0x139   :  { %2069 = vmatmul.mubr.f32.gmra.mrb[6].mxu1 %v2496_v25 }
 0x13a   :  { %2198 = vmatpush3.bf16.msra.mxu1 %v2155_v56  ;;  %2079 = vmatprep.mubr.f32.mxu1 %v2468_v47  ;;  %v680_v47 = vpop.permute.xlu1 %679 }
 0x13b   :  { %2199 = vmatprep.subr.bf16.mxu1 %v2341_v48 }
 0x13d   :  { %2080 = vmatmul.mubr.f32.vlgmr.msra.gmra.mrb[4].mxu1 %v2488_v17 }
 0x13e   :  { %2082 = vmatprep.mubr.f32.mxu1 %v2490_v18  ;;  %v690_v18 = vpop.permute.xlu1 %689 }
 0x141   :  { %2083 = vmatmul.mubr.f32.gmra.mrb[6].mxu1 %v2496_v25  ;;  %v1335_v25 = vld [vmem:[%s2595_s5] sm:$0xff]  ;;  %s2344_s5 = smov [#allocation2]  }
 0x142   :  { %2093 = vmatprep.mubr.msk.f32.mxu1 %vm2342_vm3, %v2343_v49  ;;  %v1343_v28 = vsel %vm692_vm2, %v1335_v25, 0  ;;  %s1837_s9 = sshll.u32 %s2344_s5, 4  ;;  %s1838_s9 = int_to_ptr.vmem [resolvable:$true] %s1837_s9 }
 0x143   :  { %v2554_v29 = vand.u32 4294901760, %v1343_v28  ;;  %s2316_s10 = scalar_lea.vmem %s1838_s9, 128  ;;  %p2321_p1 = scmp.lt.s32.totalorder %s1838_s9, %s1838_s9 }
 0x144   :  { %p2317_p0 = scmp.ne.s32.totalorder %s1838_s9, %s2316_s10  ;;  %p2322_p2 = scmp.lt.s32.totalorder %s2316_s10, %s2316_s10 }
 0x145   :  { %v1415_v33 = vsub.f32 %v1343_v28, %v2554_v29 }
 0x146   :  { %p2323_p3 = por %p2322_p2, %p2321_p1 }
 0x147   :  { %v1416_v41 = vand.u32 4294901760, %v1415_v33 }
 0x148   :  { %p2324_p4 = pnand %p2323_p3, %p2317_p0 }
 0x149   :  { %v1417_v54 = vsub.f32 %v1415_v33, %v1416_v41 }
 0x14b   :  { %v1418_v1 = vand.u32 4294901760, %v1417_v54 }
 0x210   :  { %v2081_v13 = vpop.f32.mrb[4].mxu1 }
 0x211   :  { %v2243_v14 = vadd.f32 %v2081_v13, %v680_v47  ;;  %v1297_v15 = vpop.f32.mrb[5].mxu1 }
 0x212   :  { %v2244_v16 = vadd.f32 %v1297_v15, %v675_v12 }
 0x213   :  { %v1320_v17 = vmul.f32 0.5, %v2243_v14  ;;  %v1340_v14 = vpop.permute.xlu0 %1339 }
 0x214   :  { %v1319_v19 = vmul.f32 0.5, %v2244_v16  ;;  %v2084_v20 = vpop.f32.mrb[6].mxu1 }
 0x215   :  { %2308 = vtanh.f32 %v1320_v17  ;;  %v2245_v22 = vadd.f32 %v2084_v20, %v690_v18  ;;  %v1309_v23 = vpop.f32.mrb[7].mxu1 }
 0x216   :  { %2310 = vtanh.f32 %v1319_v19  ;;  %v2246_v24 = vadd.f32 %v1309_v23, %v685_v21 }
 0x217   :  { %v1322_v26 = vmul.f32 0.5, %v2245_v22 }
 0x218   :  { %v1321_v27 = vmul.f32 0.5, %v2246_v24 }
 0x219   :  { %2312 = vtanh.f32 %v1322_v26 }
 0x21a   :  { %2314 = vtanh.f32 %v1321_v27 }
 0x21f   :  { %v2309_v30 = vpop.eup %2308 }
 0x220   :  { %v2311_v31 = vpop.eup %2310  ;;  %v1328_v32 = vadd.f32 1.0, %v2309_v30 }
 0x221   :  { %v1327_v34 = vadd.f32 1.0, %v2311_v31 }
 0x222   :  { %v1332_v35 = vmul.f32 0.5, %v1328_v32 }
 0x223   :  { %v2313_v36 = vpop.eup %2312  ;;  %v1331_v37 = vmul.f32 0.5, %v1327_v34 }
 0x224   :  { %v2315_v38 = vpop.eup %2314  ;;  %v1349_v39 = vand.u32 4294901760, %v1332_v35  ;;  %v1330_v40 = vadd.f32 1.0, %v2313_v36 }
 0x225   :  { %v1346_v42 = vand.u32 4294901760, %v1331_v37  ;;  %v1329_v43 = vadd.f32 1.0, %v2315_v38 }
 0x226   :  { %v1433_v44 = vsub.f32 %v1332_v35, %v1349_v39  ;;  %v1334_v45 = vmul.f32 0.5, %v1330_v40 }
 0x227   :  { %v1426_v46 = vsub.f32 %v1331_v37, %v1346_v42  ;;  %v1333_v50 = vmul.f32 0.5, %v1329_v43  ;;  %v2200_v51 = vpack.c.bf16 %v1349_v39, %v1346_v42 }
 0x228   :  { %v1434_v52 = vand.u32 4294901760, %v1433_v44  ;;  %v1355_v53 = vand.u32 4294901760, %v1334_v45 }
 0x229   :  { %v1427_v55 = vand.u32 4294901760, %v1426_v46  ;;  %v1352_v56 = vand.u32 4294901760, %v1333_v50  ;;  %2201 = vmatpush3.bf16.msra.mxu1 %v2200_v51  ;;  %v2212_v57 = vpack.c.bf16 %v1433_v44, %v1426_v46 }
 0x22a   :  { %v1447_v58 = vsub.f32 %v1334_v45, %v1355_v53  ;;  %2202 = vmatprep.subr.bf16.mxu1 %v2341_v48  ;;  %v1435_v59 = vsub.f32 %v1433_v44, %v1434_v52 }
 0x22b   :  { %v1440_v60 = vsub.f32 %v1333_v50, %v1352_v56  ;;  %v2203_v61 = vpack.c.bf16 %v1355_v53, %v1352_v56  ;;  %v1428_v62 = vsub.f32 %v1426_v46, %v1427_v55  ;;  %v2224_v63 = vpack.c.bf16 %v1434_v52, %v1427_v55 }
 0x22c   :  { %v1448_v0 = vand.u32 4294901760, %v1447_v58  ;;  %v1436_v2 = vand.u32 4294901760, %v1435_v59 }
 0x22d   :  { %v1441_v3 = vand.u32 4294901760, %v1440_v60  ;;  %2204 = vmatpush3.bf16.msra.mxu1 %v2203_v61  ;;  %v1429_v4 = vand.u32 4294901760, %v1428_v62  ;;  %v2215_v5 = vpack.c.bf16 %v1447_v58, %v1440_v60 }
 0x22e   :  { %v1449_v6 = vsub.f32 %v1447_v58, %v1448_v0 }
 0x22f   :  { %v2206_v7 = vpack.c.bf16 %v1436_v2, %v1429_v4  ;;  %v1442_v8 = vsub.f32 %v1440_v60, %v1441_v3  ;;  %v2227_v9 = vpack.c.bf16 %v1448_v0, %v1441_v3 }
 0x230   :  { %2094 = vmatmul.mubr.f32.vlgmr.msra.gmra.mrb[8].mxu1 %v1418_v1  ;;  %v1450_v10 = vand.u32 4294901760, %v1449_v6 }
 0x231   :  { %2207 = vmatpush3.bf16.msra.mxu0 %v2206_v7  ;;  %v1443_v11 = vand.u32 4294901760, %v1442_v8 }
 0x232   :  { %2208 = vmatprep.subr.bf16.mxu0 %v2341_v48 }
 0x233   :  { %v2209_v47 = vpack.c.bf16 %v1450_v10, %v1443_v11 }
 0x235   :  { %2210 = vmatpush3.bf16.msra.mxu0 %v2209_v47 }
 0x236   :  { %2211 = vmatprep.subr.bf16.mxu0 %v2341_v48 }
 0x238   :  { %2105 = vmatmul.mubr.f32.vlgmr.msra.gmra.mrb[4].mxu0 %v2554_v29 }
 0x239   :  { %2213 = vmatpush3.bf16.msra.mxu0 %v2212_v57  ;;  %2115 = vmatprep.mubr.msk.f32.mxu0 %vm2342_vm3, %v2343_v49 }
 0x23a   :  { %2214 = vmatprep.subr.bf16.mxu0 %v2341_v48 }
 0x23d   :  { %2216 = vmatpush3.bf16.msra.mxu0 %v2215_v5 }
 0x23e   :  { %2217 = vmatprep.subr.bf16.mxu0 %v2341_v48 }
 0x240   :  { %2116 = vmatmul.mubr.f32.vlgmr.msra.gmra.mrb[4].mxu0 %v1415_v33 }
 0x241   :  { %2219 = vmatpush3.bf16.msra.mxu0 %v2200_v51  ;;  %2126 = vmatprep.mubr.msk.f32.mxu0 %vm2342_vm3, %v2343_v49 }
 0x242   :  { %2220 = vmatprep.subr.bf16.mxu0 %v2341_v48 }
 0x245   :  { %2222 = vmatpush3.bf16.msra.mxu0 %v2203_v61 }
 0x246   :  { %2223 = vmatprep.subr.bf16.mxu0 %v2341_v48 }
 0x248   :  { %2127 = vmatmul.mubr.f32.vlgmr.msra.gmra.mrb[4].mxu0 %v1416_v41 }
 0x249   :  { %2225 = vmatpush3.bf16.msra.mxu0 %v2224_v63  ;;  %2137 = vmatprep.mubr.msk.f32.mxu0 %vm2342_vm3, %v2343_v49 }
 0x24a   :  { %2226 = vmatprep.subr.bf16.mxu0 %v2341_v48 }
 0x24d   :  { %2228 = vmatpush3.bf16.msra.mxu0 %v2227_v9 }
 0x24e   :  { %2229 = vmatprep.subr.bf16.mxu0 %v2341_v48 }
 0x250   :  { %2138 = vmatmul.mubr.f32.vlgmr.msra.gmra.mrb[4].mxu0 %v2554_v29 }
 0x251   :  { %2231 = vmatpush3.bf16.msra.mxu0 %v2200_v51  ;;  %2148 = vmatprep.mubr.msk.f32.mxu0 %vm2342_vm3, %v2343_v49 }
 0x252   :  { %2232 = vmatprep.subr.bf16.mxu0 %v2341_v48 }
 0x255   :  { %2234 = vmatpush3.bf16.msra.mxu0 %v2203_v61 }
 0x258   :  { %2149 = vmatmul.mubr.f32.vlgmr.msra.gmra.mrb[4].mxu0 %v2554_v29 }
 0x303   :  { %v1420_v12 = vpop.f32.mrb[8].mxu1 }
 0x304   :  { %v2095_v13 = vpop.f32.mrb[9].mxu1  ;;  %v1421_v15 = vadd.f32 %v1420_v12, %v1340_v14 }
 0x32b   :  { %v1826_v16 = vpop.f32.mrb[4].mxu0 }
 0x32c   :  { %v2248_v17 = vadd.f32 %v1826_v16, %v1421_v15  ;;  %v2150_v18 = vpop.f32.mrb[5].mxu0 }
 0x32e   :  { %1830 = vst [vmem:[#allocation2] sm:$0xff] %v2248_v17 }
 0x32f   :  { %2327 = shalt.err (!%p2324_p4)
}
 0x330   :  { %s2328_s12 = scalar_lea.hbm %s2597_s7, 128 }
 0x331   :  { %p2329_p5 = scmp.ne.s32.totalorder %s2597_s7, %s2328_s12  ;;  %p2332_p6 = scmp.lt.u32.totalorder %s2328_s12, %s2597_s7 }
 0x333   :  { %p2334_p7 = pnand %p2332_p6, %p2329_p5 }
 0x335   :  { %2337 = shalt.err (!%p2334_p7)
}
 0x336   :  { %1840 = dma.vmem_to_hbm [thread:$0]  %s1838_s9, 128, %s2597_s7, [#allocation3]  }
 0x337   :  { %2338 = dma.done.wait [#allocation3], 128  }
 0x338   :  { %2339 = vsyncadd [#allocation3], 4294967168 }
 0x339   :  { %1844 = vsyncpa [#allocation3], 1 }

</bundles_post_ra>
